<compile_context>
chip_gen: v5e
topology: v5e:2x2
jax: 0.10.0
libtpu: 0.0.40
codegen_flags: <defaults>
</compile_context>

<pallas_src>
import functools

import jax
import jax.numpy as jnp
from jax import lax
from jax.experimental import pallas as pl
from jax.experimental.pallas import tpu as pltpu

NUM_CLASSES = 3


def bilstm_tail_kernel(tok_ref, emb_ref, wx_ref, wh_ref, b_ref, wlin_ref,
                       blin_ref, out_ref, xp_ref, *, T, BT, H):
    # tok_ref : [1, T*BT, 1] int32  token ids for this batch tile, time-major
    # emb_ref : [V, E]      embedding table (compute dtype)
    # wx_ref  : [E, 4H]     fused input->hidden weights, gate order (i, f, o, g)
    # wh_ref  : [H, 4H]     fused hidden->hidden weights, same gate order
    # b_ref   : [1, 4H]     combined bias (b_ih + b_hh), f32
    # wlin_ref: [H, 3]      classifier weight
    # blin_ref: [1, 3]      classifier bias
    # out_ref : [BT, 3]
    # xp_ref  : [T*BT, 4H]  f32 VMEM scratch for the hoisted input projection
    V = emb_ref.shape[0]
    TB = T * BT
    cdt = emb_ref.dtype  # MXU operand dtype (bf16 in perf config, f32 in check)

    # ---- Phase 1 (off the recurrence critical path) --------------------------
    # In-kernel embedding gather via a one-hot matmul on the MXU, then the fused
    # input->hidden projection for ALL timesteps at once, bias folded in once.
    ids = tok_ref[0]                                            # [TB, 1] int32
    iota_v = lax.broadcasted_iota(jnp.int32, (TB, V), 1)
    onehot = jnp.where(iota_v == ids, 1.0, 0.0).astype(cdt)     # [TB, V]
    x_all = jnp.dot(onehot, emb_ref[...],
                    preferred_element_type=cdt)                 # [TB, E] exact gather
    xp_ref[...] = (jnp.dot(x_all, wx_ref[...],
                           preferred_element_type=jnp.float32)
                   + b_ref[...])                                # [TB, 4H] f32

    wh = wh_ref[...]                                            # hoisted, resident
    h0 = jnp.zeros((BT, H), jnp.float32)
    c0 = jnp.zeros((BT, H), jnp.float32)

    # ---- Phase 2: reverse-direction recurrence (t = T-1 .. 0) ----------------
    # Single fused [BT,H]x[H,4H] matmul per step on the serial chain; gate
    # elementwise math stays f32 (v5e has no bf16 VPU/EUP path).
    def step(s, carry):
        h, c = carry
        t = T - 1 - s
        row = pl.multiple_of(t * BT, BT)
        gates = xp_ref[pl.ds(row, BT), :] + jnp.dot(
            h.astype(cdt), wh, preferred_element_type=jnp.float32)  # [BT, 4H] f32
        sig = jax.nn.sigmoid(gates[:, : 3 * H])                 # i, f, o gates
        i_g = sig[:, :H]
        f_g = sig[:, H:2 * H]
        o_g = sig[:, 2 * H:]
        g_g = jnp.tanh(gates[:, 3 * H:])
        c_new = f_g * c + i_g * g_g
        h_new = o_g * jnp.tanh(c_new)
        return (h_new, c_new)

    h_rev, _ = lax.fori_loop(0, T, step, (h0, c0), unroll=True)

    # ---- Epilogue: classifier folded in right after the last step ------------
    out_ref[...] = (jnp.dot(h_rev, wlin_ref[...],
                            preferred_element_type=jnp.float32)
                    + blin_ref[...])


def _round_up(x, m):
    return (x + m - 1) // m * m


def init_params(key, vocab_size, embedding_dim, hidden_dim):
    ks = jax.random.split(key, 12)
    V, E, H = vocab_size, embedding_dim, hidden_dim
    k = 1.0 / jnp.sqrt(jnp.float32(H))

    emb = jax.random.normal(ks[0], (V, E), jnp.float32)
    emb = emb.at[0].set(0.0)                       # padding_idx=0

    # Reverse-direction LSTM weights (the only direction feeding ht[-1]).
    # Gate order along the leading axis: (i, f, g, o), PyTorch-style.
    w_ih_rev = jax.random.uniform(ks[1], (4, E, H), jnp.float32, -k, k)
    w_hh_rev = jax.random.uniform(ks[2], (4, H, H), jnp.float32, -k, k)
    b_rev = (jax.random.uniform(ks[3], (4, 1, H), jnp.float32, -k, k)
             + jax.random.uniform(ks[4], (4, 1, H), jnp.float32, -k, k))

    # Forward-direction weights exist in the PyTorch module but never influence
    # linear(ht[-1]); kept only for parameter-shape parity.
    w_ih_fwd = jax.random.uniform(ks[5], (4, E, H), jnp.float32, -k, k)
    w_hh_fwd = jax.random.uniform(ks[6], (4, H, H), jnp.float32, -k, k)
    b_fwd = (jax.random.uniform(ks[7], (4, 1, H), jnp.float32, -k, k)
             + jax.random.uniform(ks[8], (4, 1, H), jnp.float32, -k, k))

    w_lin = jax.random.uniform(ks[9], (H, NUM_CLASSES), jnp.float32, -k, k)
    b_lin = jax.random.uniform(ks[10], (1, NUM_CLASSES), jnp.float32, -k, k)

    return dict(embedding=emb,
                w_ih_rev=w_ih_rev, w_hh_rev=w_hh_rev, b_rev=b_rev,
                w_ih_fwd=w_ih_fwd, w_hh_fwd=w_hh_fwd, b_fwd=b_fwd,
                w_lin=w_lin, b_lin=b_lin)


def bilstm_fixed_length_forward(tokens, lengths, params, *,
                                compute_dtype=jnp.bfloat16, b_tile=None):
    """tokens: [B, T] int32; lengths: [B] int32 (unused, as in the PyTorch module)."""
    del lengths   # nn.LSTM without pack_padded_sequence ignores lengths
    B, T = tokens.shape
    H = params["w_hh_rev"].shape[-1]

    # ---- fuse & reorder weights for the kernel (gate order i, f, o, g) -------
    order = (0, 1, 3, 2)   # from (i, f, g, o) storage -> (i, f, o, g) kernel layout
    wx = jnp.concatenate([params["w_ih_rev"][g] for g in order],
                         axis=1).astype(compute_dtype)          # [E, 4H]
    wh = jnp.concatenate([params["w_hh_rev"][g] for g in order],
                         axis=1).astype(compute_dtype)          # [H, 4H]
    b_gates = jnp.concatenate([params["b_rev"][g] for g in order],
                              axis=1).astype(jnp.float32)       # [1, 4H]
    emb = params["embedding"].astype(compute_dtype)             # [V, E]
    wlin = params["w_lin"].astype(jnp.float32)                  # [H, 3]
    blin = params["b_lin"].astype(jnp.float32)                  # [1, 3]

    # ---- batch padding (full sublanes) + batch tiling -------------------------
    if b_tile is None:
        b_tile = min(_round_up(B, 8), 128)
    B_pad = _round_up(B, b_tile)
    nb = B_pad // b_tile

    # Padded rows get token 0 -> zero embedding row; they are sliced off below.
    tok = jnp.pad(tokens.astype(jnp.int32), ((0, B_pad - B), (0, 0)))
    # [B_pad, T] -> [nb, b_tile, T] -> [nb, T, b_tile] -> [nb, T*b_tile, 1]
    # (time-major rows within each batch tile; a tiny int32 reshuffle -- NOT the
    #  [T,B,E] embedding HBM round trip the old wrapper did).
    tok = tok.reshape(nb, b_tile, T).transpose(0, 2, 1).reshape(nb, T * b_tile, 1)

    # TODO(synk): training-mode dropout(p=0.7) would use pltpu.prng_random_bits;
    # eval-mode (identity) semantics are used here.

    kernel = functools.partial(bilstm_tail_kernel, T=T, BT=b_tile, H=H)
    out = pl.pallas_call(
        kernel,
        out_shape=jax.ShapeDtypeStruct((B_pad, NUM_CLASSES), jnp.float32),
        grid=(nb,),
        in_specs=[
            pl.BlockSpec((1, T * b_tile, 1), lambda i: (i, 0, 0)),  # tokens per tile
            pl.BlockSpec(emb.shape, lambda i: (0, 0)),              # resident table
            pl.BlockSpec(wx.shape, lambda i: (0, 0)),
            pl.BlockSpec(wh.shape, lambda i: (0, 0)),
            pl.BlockSpec(b_gates.shape, lambda i: (0, 0)),
            pl.BlockSpec(wlin.shape, lambda i: (0, 0)),
            pl.BlockSpec(blin.shape, lambda i: (0, 0)),
        ],
        out_specs=pl.BlockSpec((b_tile, NUM_CLASSES), lambda i: (i, 0)),
        scratch_shapes=[pltpu.VMEM((T * b_tile, 4 * H), jnp.float32)],
        compiler_params=pltpu.CompilerParams(
            dimension_semantics=("parallel",)),
    )(tok, emb, wx, wh, b_gates, wlin, blin)
    return out[:B]


def reference_forward(tokens, params):
    """Pure-JAX f32 reference of the same forward pass (for correctness check)."""
    x = jnp.take(params["embedding"], tokens, axis=0)   # [B, T, E]
    B, T, _ = x.shape
    H = params["w_hh_rev"].shape[-1]
    h = jnp.zeros((B, H), jnp.float32)
    c = jnp.zeros((B, H), jnp.float32)
    for s in range(T):
        t = T - 1 - s
        xt = x[:, t, :]
        g = [xt @ params["w_ih_rev"][i] + h @ params["w_hh_rev"][i] + params["b_rev"][i]
             for i in range(4)]
        i_g = jax.nn.sigmoid(g[0]); f_g = jax.nn.sigmoid(g[1])
        g_g = jnp.tanh(g[2]);       o_g = jax.nn.sigmoid(g[3])
        c = f_g * c + i_g * g_g
        h = o_g * jnp.tanh(c)
    return h @ params["w_lin"] + params["b_lin"]


if __name__ == "__main__":
    VOCAB, EMB, HID = 50, 32, 32
    B, T = 2, 8

    key = jax.random.PRNGKey(0)
    k_par, k_tok, _ = jax.random.split(key, 3)
    params = init_params(k_par, VOCAB, EMB, HID)

    tokens = jax.random.randint(k_tok, (B, T), 0, VOCAB, dtype=jnp.int32)
    lengths = jnp.full((B,), T, dtype=jnp.int32)

    ref = reference_forward(tokens, params)

    # Strict correctness check of the kernel math (f32 compute path).
    out_f32 = jax.block_until_ready(
        bilstm_fixed_length_forward(tokens, lengths, params,
                                    compute_dtype=jnp.float32))
    assert out_f32.shape == (B, NUM_CLASSES)
    assert jnp.allclose(out_f32, ref, atol=1e-3, rtol=1e-3), (out_f32, ref)

    # Performance configuration: bf16 MXU operands, f32 accumulation/carries.
    out_bf16 = jax.block_until_ready(
        bilstm_fixed_length_forward(tokens, lengths, params,
                                    compute_dtype=jnp.bfloat16))
    assert out_bf16.shape == (B, NUM_CLASSES)
    assert jnp.allclose(out_bf16, ref, atol=5e-2, rtol=5e-2), (out_bf16, ref)

    print("KERNEL_OK")
</pallas_src>

<mosaic_0001>
module attributes {stable_mosaic.version = 11 : i64} {
  func.func @bilstm_tail_kernel(%arg0: i32, %arg1: memref<1x64x1xi32, #tpu.memory_space<vmem>>, %arg2: memref<50x32xf32, #tpu.memory_space<vmem>>, %arg3: memref<32x128xf32, #tpu.memory_space<vmem>>, %arg4: memref<32x128xf32, #tpu.memory_space<vmem>>, %arg5: memref<1x128xf32, #tpu.memory_space<vmem>>, %arg6: memref<32x3xf32, #tpu.memory_space<vmem>>, %arg7: memref<1x3xf32, #tpu.memory_space<vmem>>, %arg8: memref<8x3xf32, #tpu.memory_space<vmem>>, %arg9: memref<64x128xf32, #tpu.memory_space<vmem>>) attributes {dimension_semantics = [#tpu.dimension_semantics<parallel>], iteration_bounds = array<i64: 1>, scalar_prefetch = 0 : i64, scratch_operands = 1 : i64, tpu.core_type = #tpu.core_type<tc>, window_params = [{transform_indices = @transform_0, window_bounds = array<i64: 1, 64, 1>}, {pipeline_mode = #tpu.pipeline_mode<synchronous>, transform_indices = @transform_1, window_bounds = array<i64: 50, 32>}, {pipeline_mode = #tpu.pipeline_mode<synchronous>, transform_indices = @transform_2, window_bounds = array<i64: 32, 128>}, {pipeline_mode = #tpu.pipeline_mode<synchronous>, transform_indices = @transform_3, window_bounds = array<i64: 32, 128>}, {pipeline_mode = #tpu.pipeline_mode<synchronous>, transform_indices = @transform_4, window_bounds = array<i64: 1, 128>}, {pipeline_mode = #tpu.pipeline_mode<synchronous>, transform_indices = @transform_5, window_bounds = array<i64: 32, 3>}, {pipeline_mode = #tpu.pipeline_mode<synchronous>, transform_indices = @transform_6, window_bounds = array<i64: 1, 3>}, {transform_indices = @transform_7, window_bounds = array<i64: 8, 3>}]} {
    %c0 = arith.constant 0 : index
    %c0_0 = arith.constant 0 : index
    %c0_1 = arith.constant 0 : index
    %0 = vector.load %arg1[%c0, %c0_0, %c0_1] : memref<1x64x1xi32, #tpu.memory_space<vmem>>, vector<1x64x1xi32>
    %1 = vector.shape_cast %0 : vector<1x64x1xi32> to vector<64x1xi32>
    %2 = tpu.iota {dimensions = array<i32: 1>} : vector<64x50xi32>
    %3 = vector.broadcast %1 : vector<64x1xi32> to vector<64x50xi32>
    %4 = arith.cmpi eq, %2, %3 : vector<64x50xi32>
    %cst = arith.constant 1.000000e+00 : f32
    %cst_2 = arith.constant 0.000000e+00 : f32
    %5 = vector.broadcast %cst : f32 to vector<64x50xf32>
    %6 = vector.broadcast %cst_2 : f32 to vector<64x50xf32>
    %7 = arith.select %4, %5, %6 : vector<64x50xi1>, vector<64x50xf32>
    %c0_3 = arith.constant 0 : index
    %c0_4 = arith.constant 0 : index
    %8 = vector.load %arg2[%c0_3, %c0_4] : memref<50x32xf32, #tpu.memory_space<vmem>>, vector<50x32xf32>
    %cst_5 = arith.constant dense<0.000000e+00> : vector<64x32xf32>
    %9 = tpu.matmul %7, %8, %cst_5 {dimension_numbers = #tpu.dot_dimension_numbers<[1], [0], [0], [1], [0, 0, 1, 1], [], []>} : vector<64x50xf32>, vector<50x32xf32>, vector<64x32xf32> -> vector<64x32xf32>
    %c0_6 = arith.constant 0 : index
    %c0_7 = arith.constant 0 : index
    %10 = vector.load %arg3[%c0_6, %c0_7] : memref<32x128xf32, #tpu.memory_space<vmem>>, vector<32x128xf32>
    %cst_8 = arith.constant dense<0.000000e+00> : vector<64x128xf32>
    %11 = tpu.matmul %9, %10, %cst_8 {dimension_numbers = #tpu.dot_dimension_numbers<[1], [0], [0], [1], [0, 0, 1, 1], [], []>} : vector<64x32xf32>, vector<32x128xf32>, vector<64x128xf32> -> vector<64x128xf32>
    %c0_9 = arith.constant 0 : index
    %c0_10 = arith.constant 0 : index
    %12 = vector.load %arg5[%c0_9, %c0_10] : memref<1x128xf32, #tpu.memory_space<vmem>>, vector<1x128xf32>
    %13 = vector.broadcast %12 : vector<1x128xf32> to vector<64x128xf32>
    %14 = arith.addf %11, %13 : vector<64x128xf32>
    %c0_11 = arith.constant 0 : index
    %c0_12 = arith.constant 0 : index
    %15 = vector.load %arg9[%c0_11, %c0_12] : memref<64x128xf32, #tpu.memory_space<vmem>>, vector<64x128xf32>
    tpu.vector_store %arg9[%c0_11, %c0_12], %14 {strides = array<i32>} : memref<64x128xf32, #tpu.memory_space<vmem>>, vector<64x128xf32>,
    %c0_13 = arith.constant 0 : index
    %c0_14 = arith.constant 0 : index
    %16 = vector.load %arg4[%c0_13, %c0_14] : memref<32x128xf32, #tpu.memory_space<vmem>>, vector<32x128xf32>
    %cst_15 = arith.constant 0.000000e+00 : f32
    %17 = vector.broadcast %cst_15 : f32 to vector<8x32xf32>
    %cst_16 = arith.constant 0.000000e+00 : f32
    %18 = vector.broadcast %cst_16 : f32 to vector<8x32xf32>
    %c0_i32 = arith.constant 0 : i32
    %c7_i32 = arith.constant 7 : i32
    %19 = arith.subi %c7_i32, %c0_i32 : i32
    %c8_i32 = arith.constant 8 : i32
    %20 = arith.muli %19, %c8_i32 : i32
    %21 = tpu.assume_multiple %20, 8 : i32
    %22 = arith.index_cast %21 : i32 to index
    %c0_17 = arith.constant 0 : index
    %23 = vector.load %arg9[%22, %c0_17] : memref<64x128xf32, #tpu.memory_space<vmem>>, vector<8x128xf32>
    %cst_18 = arith.constant dense<0.000000e+00> : vector<8x128xf32>
    %24 = tpu.matmul %17, %16, %cst_18 {dimension_numbers = #tpu.dot_dimension_numbers<[1], [0], [0], [1], [0, 0, 1, 1], [], []>} : vector<8x32xf32>, vector<32x128xf32>, vector<8x128xf32> -> vector<8x128xf32>
    %25 = arith.addf %23, %24 : vector<8x128xf32>
    %26 = vector.extract_strided_slice %25 {offsets = [0, 0], sizes = [8, 96], strides = [1, 1]} : vector<8x128xf32> to vector<8x96xf32>
    %27 = arith.negf %26 : vector<8x96xf32>
    %28 = math.exp %27 : vector<8x96xf32>
    %cst_19 = arith.constant 1.000000e+00 : f32
    %29 = vector.broadcast %cst_19 : f32 to vector<8x96xf32>
    %30 = arith.addf %29, %28 : vector<8x96xf32>
    %31 = arith.divf %29, %30 : vector<8x96xf32>
    %32 = vector.extract_strided_slice %31 {offsets = [0, 0], sizes = [8, 32], strides = [1, 1]} : vector<8x96xf32> to vector<8x32xf32>
    %33 = vector.extract_strided_slice %31 {offsets = [0, 32], sizes = [8, 32], strides = [1, 1]} : vector<8x96xf32> to vector<8x32xf32>
    %34 = vector.extract_strided_slice %31 {offsets = [0, 64], sizes = [8, 32], strides = [1, 1]} : vector<8x96xf32> to vector<8x32xf32>
    %35 = vector.extract_strided_slice %25 {offsets = [0, 96], sizes = [8, 32], strides = [1, 1]} : vector<8x128xf32> to vector<8x32xf32>
    %36 = math.tanh %35 : vector<8x32xf32>
    %37 = arith.mulf %33, %18 : vector<8x32xf32>
    %38 = arith.mulf %32, %36 : vector<8x32xf32>
    %39 = arith.addf %37, %38 : vector<8x32xf32>
    %40 = math.tanh %39 : vector<8x32xf32>
    %41 = arith.mulf %34, %40 : vector<8x32xf32>
    %c1_i32 = arith.constant 1 : i32
    %c7_i32_20 = arith.constant 7 : i32
    %42 = arith.subi %c7_i32_20, %c1_i32 : i32
    %c8_i32_21 = arith.constant 8 : i32
    %43 = arith.muli %42, %c8_i32_21 : i32
    %44 = tpu.assume_multiple %43, 8 : i32
    %45 = arith.index_cast %44 : i32 to index
    %c0_22 = arith.constant 0 : index
    %46 = vector.load %arg9[%45, %c0_22] : memref<64x128xf32, #tpu.memory_space<vmem>>, vector<8x128xf32>
    %cst_23 = arith.constant dense<0.000000e+00> : vector<8x128xf32>
    %47 = tpu.matmul %41, %16, %cst_23 {dimension_numbers = #tpu.dot_dimension_numbers<[1], [0], [0], [1], [0, 0, 1, 1], [], []>} : vector<8x32xf32>, vector<32x128xf32>, vector<8x128xf32> -> vector<8x128xf32>
    %48 = arith.addf %46, %47 : vector<8x128xf32>
    %49 = vector.extract_strided_slice %48 {offsets = [0, 0], sizes = [8, 96], strides = [1, 1]} : vector<8x128xf32> to vector<8x96xf32>
    %50 = arith.negf %49 : vector<8x96xf32>
    %51 = math.exp %50 : vector<8x96xf32>
    %cst_24 = arith.constant 1.000000e+00 : f32
    %52 = vector.broadcast %cst_24 : f32 to vector<8x96xf32>
    %53 = arith.addf %52, %51 : vector<8x96xf32>
    %54 = arith.divf %52, %53 : vector<8x96xf32>
    %55 = vector.extract_strided_slice %54 {offsets = [0, 0], sizes = [8, 32], strides = [1, 1]} : vector<8x96xf32> to vector<8x32xf32>
    %56 = vector.extract_strided_slice %54 {offsets = [0, 32], sizes = [8, 32], strides = [1, 1]} : vector<8x96xf32> to vector<8x32xf32>
    %57 = vector.extract_strided_slice %54 {offsets = [0, 64], sizes = [8, 32], strides = [1, 1]} : vector<8x96xf32> to vector<8x32xf32>
    %58 = vector.extract_strided_slice %48 {offsets = [0, 96], sizes = [8, 32], strides = [1, 1]} : vector<8x128xf32> to vector<8x32xf32>
    %59 = math.tanh %58 : vector<8x32xf32>
    %60 = arith.mulf %56, %39 : vector<8x32xf32>
    %61 = arith.mulf %55, %59 : vector<8x32xf32>
    %62 = arith.addf %60, %61 : vector<8x32xf32>
    %63 = math.tanh %62 : vector<8x32xf32>
    %64 = arith.mulf %57, %63 : vector<8x32xf32>
    %c2_i32 = arith.constant 2 : i32
    %c7_i32_25 = arith.constant 7 : i32
    %65 = arith.subi %c7_i32_25, %c2_i32 : i32
    %c8_i32_26 = arith.constant 8 : i32
    %66 = arith.muli %65, %c8_i32_26 : i32
    %67 = tpu.assume_multiple %66, 8 : i32
    %68 = arith.index_cast %67 : i32 to index
    %c0_27 = arith.constant 0 : index
    %69 = vector.load %arg9[%68, %c0_27] : memref<64x128xf32, #tpu.memory_space<vmem>>, vector<8x128xf32>
    %cst_28 = arith.constant dense<0.000000e+00> : vector<8x128xf32>
    %70 = tpu.matmul %64, %16, %cst_28 {dimension_numbers = #tpu.dot_dimension_numbers<[1], [0], [0], [1], [0, 0, 1, 1], [], []>} : vector<8x32xf32>, vector<32x128xf32>, vector<8x128xf32> -> vector<8x128xf32>
    %71 = arith.addf %69, %70 : vector<8x128xf32>
    %72 = vector.extract_strided_slice %71 {offsets = [0, 0], sizes = [8, 96], strides = [1, 1]} : vector<8x128xf32> to vector<8x96xf32>
    %73 = arith.negf %72 : vector<8x96xf32>
    %74 = math.exp %73 : vector<8x96xf32>
    %cst_29 = arith.constant 1.000000e+00 : f32
    %75 = vector.broadcast %cst_29 : f32 to vector<8x96xf32>
    %76 = arith.addf %75, %74 : vector<8x96xf32>
    %77 = arith.divf %75, %76 : vector<8x96xf32>
    %78 = vector.extract_strided_slice %77 {offsets = [0, 0], sizes = [8, 32], strides = [1, 1]} : vector<8x96xf32> to vector<8x32xf32>
    %79 = vector.extract_strided_slice %77 {offsets = [0, 32], sizes = [8, 32], strides = [1, 1]} : vector<8x96xf32> to vector<8x32xf32>
    %80 = vector.extract_strided_slice %77 {offsets = [0, 64], sizes = [8, 32], strides = [1, 1]} : vector<8x96xf32> to vector<8x32xf32>
    %81 = vector.extract_strided_slice %71 {offsets = [0, 96], sizes = [8, 32], strides = [1, 1]} : vector<8x128xf32> to vector<8x32xf32>
    %82 = math.tanh %81 : vector<8x32xf32>
    %83 = arith.mulf %79, %62 : vector<8x32xf32>
    %84 = arith.mulf %78, %82 : vector<8x32xf32>
    %85 = arith.addf %83, %84 : vector<8x32xf32>
    %86 = math.tanh %85 : vector<8x32xf32>
    %87 = arith.mulf %80, %86 : vector<8x32xf32>
    %c3_i32 = arith.constant 3 : i32
    %c7_i32_30 = arith.constant 7 : i32
    %88 = arith.subi %c7_i32_30, %c3_i32 : i32
    %c8_i32_31 = arith.constant 8 : i32
    %89 = arith.muli %88, %c8_i32_31 : i32
    %90 = tpu.assume_multiple %89, 8 : i32
    %91 = arith.index_cast %90 : i32 to index
    %c0_32 = arith.constant 0 : index
    %92 = vector.load %arg9[%91, %c0_32] : memref<64x128xf32, #tpu.memory_space<vmem>>, vector<8x128xf32>
    %cst_33 = arith.constant dense<0.000000e+00> : vector<8x128xf32>
    %93 = tpu.matmul %87, %16, %cst_33 {dimension_numbers = #tpu.dot_dimension_numbers<[1], [0], [0], [1], [0, 0, 1, 1], [], []>} : vector<8x32xf32>, vector<32x128xf32>, vector<8x128xf32> -> vector<8x128xf32>
    %94 = arith.addf %92, %93 : vector<8x128xf32>
    %95 = vector.extract_strided_slice %94 {offsets = [0, 0], sizes = [8, 96], strides = [1, 1]} : vector<8x128xf32> to vector<8x96xf32>
    %96 = arith.negf %95 : vector<8x96xf32>
    %97 = math.exp %96 : vector<8x96xf32>
    %cst_34 = arith.constant 1.000000e+00 : f32
    %98 = vector.broadcast %cst_34 : f32 to vector<8x96xf32>
    %99 = arith.addf %98, %97 : vector<8x96xf32>
    %100 = arith.divf %98, %99 : vector<8x96xf32>
    %101 = vector.extract_strided_slice %100 {offsets = [0, 0], sizes = [8, 32], strides = [1, 1]} : vector<8x96xf32> to vector<8x32xf32>
    %102 = vector.extract_strided_slice %100 {offsets = [0, 32], sizes = [8, 32], strides = [1, 1]} : vector<8x96xf32> to vector<8x32xf32>
    %103 = vector.extract_strided_slice %100 {offsets = [0, 64], sizes = [8, 32], strides = [1, 1]} : vector<8x96xf32> to vector<8x32xf32>
    %104 = vector.extract_strided_slice %94 {offsets = [0, 96], sizes = [8, 32], strides = [1, 1]} : vector<8x128xf32> to vector<8x32xf32>
    %105 = math.tanh %104 : vector<8x32xf32>
    %106 = arith.mulf %102, %85 : vector<8x32xf32>
    %107 = arith.mulf %101, %105 : vector<8x32xf32>
    %108 = arith.addf %106, %107 : vector<8x32xf32>
    %109 = math.tanh %108 : vector<8x32xf32>
    %110 = arith.mulf %103, %109 : vector<8x32xf32>
    %c4_i32 = arith.constant 4 : i32
    %c7_i32_35 = arith.constant 7 : i32
    %111 = arith.subi %c7_i32_35, %c4_i32 : i32
    %c8_i32_36 = arith.constant 8 : i32
    %112 = arith.muli %111, %c8_i32_36 : i32
    %113 = tpu.assume_multiple %112, 8 : i32
    %114 = arith.index_cast %113 : i32 to index
    %c0_37 = arith.constant 0 : index
    %115 = vector.load %arg9[%114, %c0_37] : memref<64x128xf32, #tpu.memory_space<vmem>>, vector<8x128xf32>
    %cst_38 = arith.constant dense<0.000000e+00> : vector<8x128xf32>
    %116 = tpu.matmul %110, %16, %cst_38 {dimension_numbers = #tpu.dot_dimension_numbers<[1], [0], [0], [1], [0, 0, 1, 1], [], []>} : vector<8x32xf32>, vector<32x128xf32>, vector<8x128xf32> -> vector<8x128xf32>
    %117 = arith.addf %115, %116 : vector<8x128xf32>
    %118 = vector.extract_strided_slice %117 {offsets = [0, 0], sizes = [8, 96], strides = [1, 1]} : vector<8x128xf32> to vector<8x96xf32>
    %119 = arith.negf %118 : vector<8x96xf32>
    %120 = math.exp %119 : vector<8x96xf32>
    %cst_39 = arith.constant 1.000000e+00 : f32
    %121 = vector.broadcast %cst_39 : f32 to vector<8x96xf32>
    %122 = arith.addf %121, %120 : vector<8x96xf32>
    %123 = arith.divf %121, %122 : vector<8x96xf32>
    %124 = vector.extract_strided_slice %123 {offsets = [0, 0], sizes = [8, 32], strides = [1, 1]} : vector<8x96xf32> to vector<8x32xf32>
    %125 = vector.extract_strided_slice %123 {offsets = [0, 32], sizes = [8, 32], strides = [1, 1]} : vector<8x96xf32> to vector<8x32xf32>
    %126 = vector.extract_strided_slice %123 {offsets = [0, 64], sizes = [8, 32], strides = [1, 1]} : vector<8x96xf32> to vector<8x32xf32>
    %127 = vector.extract_strided_slice %117 {offsets = [0, 96], sizes = [8, 32], strides = [1, 1]} : vector<8x128xf32> to vector<8x32xf32>
    %128 = math.tanh %127 : vector<8x32xf32>
    %129 = arith.mulf %125, %108 : vector<8x32xf32>
    %130 = arith.mulf %124, %128 : vector<8x32xf32>
    %131 = arith.addf %129, %130 : vector<8x32xf32>
    %132 = math.tanh %131 : vector<8x32xf32>
    %133 = arith.mulf %126, %132 : vector<8x32xf32>
    %c5_i32 = arith.constant 5 : i32
    %c7_i32_40 = arith.constant 7 : i32
    %134 = arith.subi %c7_i32_40, %c5_i32 : i32
    %c8_i32_41 = arith.constant 8 : i32
    %135 = arith.muli %134, %c8_i32_41 : i32
    %136 = tpu.assume_multiple %135, 8 : i32
    %137 = arith.index_cast %136 : i32 to index
    %c0_42 = arith.constant 0 : index
    %138 = vector.load %arg9[%137, %c0_42] : memref<64x128xf32, #tpu.memory_space<vmem>>, vector<8x128xf32>
    %cst_43 = arith.constant dense<0.000000e+00> : vector<8x128xf32>
    %139 = tpu.matmul %133, %16, %cst_43 {dimension_numbers = #tpu.dot_dimension_numbers<[1], [0], [0], [1], [0, 0, 1, 1], [], []>} : vector<8x32xf32>, vector<32x128xf32>, vector<8x128xf32> -> vector<8x128xf32>
    %140 = arith.addf %138, %139 : vector<8x128xf32>
    %141 = vector.extract_strided_slice %140 {offsets = [0, 0], sizes = [8, 96], strides = [1, 1]} : vector<8x128xf32> to vector<8x96xf32>
    %142 = arith.negf %141 : vector<8x96xf32>
    %143 = math.exp %142 : vector<8x96xf32>
    %cst_44 = arith.constant 1.000000e+00 : f32
    %144 = vector.broadcast %cst_44 : f32 to vector<8x96xf32>
    %145 = arith.addf %144, %143 : vector<8x96xf32>
    %146 = arith.divf %144, %145 : vector<8x96xf32>
    %147 = vector.extract_strided_slice %146 {offsets = [0, 0], sizes = [8, 32], strides = [1, 1]} : vector<8x96xf32> to vector<8x32xf32>
    %148 = vector.extract_strided_slice %146 {offsets = [0, 32], sizes = [8, 32], strides = [1, 1]} : vector<8x96xf32> to vector<8x32xf32>
    %149 = vector.extract_strided_slice %146 {offsets = [0, 64], sizes = [8, 32], strides = [1, 1]} : vector<8x96xf32> to vector<8x32xf32>
    %150 = vector.extract_strided_slice %140 {offsets = [0, 96], sizes = [8, 32], strides = [1, 1]} : vector<8x128xf32> to vector<8x32xf32>
    %151 = math.tanh %150 : vector<8x32xf32>
    %152 = arith.mulf %148, %131 : vector<8x32xf32>
    %153 = arith.mulf %147, %151 : vector<8x32xf32>
    %154 = arith.addf %152, %153 : vector<8x32xf32>
    %155 = math.tanh %154 : vector<8x32xf32>
    %156 = arith.mulf %149, %155 : vector<8x32xf32>
    %c6_i32 = arith.constant 6 : i32
    %c7_i32_45 = arith.constant 7 : i32
    %157 = arith.subi %c7_i32_45, %c6_i32 : i32
    %c8_i32_46 = arith.constant 8 : i32
    %158 = arith.muli %157, %c8_i32_46 : i32
    %159 = tpu.assume_multiple %158, 8 : i32
    %160 = arith.index_cast %159 : i32 to index
    %c0_47 = arith.constant 0 : index
    %161 = vector.load %arg9[%160, %c0_47] : memref<64x128xf32, #tpu.memory_space<vmem>>, vector<8x128xf32>
    %cst_48 = arith.constant dense<0.000000e+00> : vector<8x128xf32>
    %162 = tpu.matmul %156, %16, %cst_48 {dimension_numbers = #tpu.dot_dimension_numbers<[1], [0], [0], [1], [0, 0, 1, 1], [], []>} : vector<8x32xf32>, vector<32x128xf32>, vector<8x128xf32> -> vector<8x128xf32>
    %163 = arith.addf %161, %162 : vector<8x128xf32>
    %164 = vector.extract_strided_slice %163 {offsets = [0, 0], sizes = [8, 96], strides = [1, 1]} : vector<8x128xf32> to vector<8x96xf32>
    %165 = arith.negf %164 : vector<8x96xf32>
    %166 = math.exp %165 : vector<8x96xf32>
    %cst_49 = arith.constant 1.000000e+00 : f32
    %167 = vector.broadcast %cst_49 : f32 to vector<8x96xf32>
    %168 = arith.addf %167, %166 : vector<8x96xf32>
    %169 = arith.divf %167, %168 : vector<8x96xf32>
    %170 = vector.extract_strided_slice %169 {offsets = [0, 0], sizes = [8, 32], strides = [1, 1]} : vector<8x96xf32> to vector<8x32xf32>
    %171 = vector.extract_strided_slice %169 {offsets = [0, 32], sizes = [8, 32], strides = [1, 1]} : vector<8x96xf32> to vector<8x32xf32>
    %172 = vector.extract_strided_slice %169 {offsets = [0, 64], sizes = [8, 32], strides = [1, 1]} : vector<8x96xf32> to vector<8x32xf32>
    %173 = vector.extract_strided_slice %163 {offsets = [0, 96], sizes = [8, 32], strides = [1, 1]} : vector<8x128xf32> to vector<8x32xf32>
    %174 = math.tanh %173 : vector<8x32xf32>
    %175 = arith.mulf %171, %154 : vector<8x32xf32>
    %176 = arith.mulf %170, %174 : vector<8x32xf32>
    %177 = arith.addf %175, %176 : vector<8x32xf32>
    %178 = math.tanh %177 : vector<8x32xf32>
    %179 = arith.mulf %172, %178 : vector<8x32xf32>
    %c7_i32_50 = arith.constant 7 : i32
    %c7_i32_51 = arith.constant 7 : i32
    %180 = arith.subi %c7_i32_51, %c7_i32_50 : i32
    %c8_i32_52 = arith.constant 8 : i32
    %181 = arith.muli %180, %c8_i32_52 : i32
    %182 = tpu.assume_multiple %181, 8 : i32
    %183 = arith.index_cast %182 : i32 to index
    %c0_53 = arith.constant 0 : index
    %184 = vector.load %arg9[%183, %c0_53] : memref<64x128xf32, #tpu.memory_space<vmem>>, vector<8x128xf32>
    %cst_54 = arith.constant dense<0.000000e+00> : vector<8x128xf32>
    %185 = tpu.matmul %179, %16, %cst_54 {dimension_numbers = #tpu.dot_dimension_numbers<[1], [0], [0], [1], [0, 0, 1, 1], [], []>} : vector<8x32xf32>, vector<32x128xf32>, vector<8x128xf32> -> vector<8x128xf32>
    %186 = arith.addf %184, %185 : vector<8x128xf32>
    %187 = vector.extract_strided_slice %186 {offsets = [0, 0], sizes = [8, 96], strides = [1, 1]} : vector<8x128xf32> to vector<8x96xf32>
    %188 = arith.negf %187 : vector<8x96xf32>
    %189 = math.exp %188 : vector<8x96xf32>
    %cst_55 = arith.constant 1.000000e+00 : f32
    %190 = vector.broadcast %cst_55 : f32 to vector<8x96xf32>
    %191 = arith.addf %190, %189 : vector<8x96xf32>
    %192 = arith.divf %190, %191 : vector<8x96xf32>
    %193 = vector.extract_strided_slice %192 {offsets = [0, 0], sizes = [8, 32], strides = [1, 1]} : vector<8x96xf32> to vector<8x32xf32>
    %194 = vector.extract_strided_slice %192 {offsets = [0, 32], sizes = [8, 32], strides = [1, 1]} : vector<8x96xf32> to vector<8x32xf32>
    %195 = vector.extract_strided_slice %192 {offsets = [0, 64], sizes = [8, 32], strides = [1, 1]} : vector<8x96xf32> to vector<8x32xf32>
    %196 = vector.extract_strided_slice %186 {offsets = [0, 96], sizes = [8, 32], strides = [1, 1]} : vector<8x128xf32> to vector<8x32xf32>
    %197 = math.tanh %196 : vector<8x32xf32>
    %198 = arith.mulf %194, %177 : vector<8x32xf32>
    %199 = arith.mulf %193, %197 : vector<8x32xf32>
    %200 = arith.addf %198, %199 : vector<8x32xf32>
    %201 = math.tanh %200 : vector<8x32xf32>
    %202 = arith.mulf %195, %201 : vector<8x32xf32>
    %c8_i32_56 = arith.constant 8 : i32
    %c0_57 = arith.constant 0 : index
    %c0_58 = arith.constant 0 : index
    %203 = vector.load %arg6[%c0_57, %c0_58] : memref<32x3xf32, #tpu.memory_space<vmem>>, vector<32x3xf32>
    %cst_59 = arith.constant dense<0.000000e+00> : vector<8x3xf32>
    %204 = tpu.matmul %202, %203, %cst_59 {dimension_numbers = #tpu.dot_dimension_numbers<[1], [0], [0], [1], [0, 0, 1, 1], [], []>} : vector<8x32xf32>, vector<32x3xf32>, vector<8x3xf32> -> vector<8x3xf32>
    %c0_60 = arith.constant 0 : index
    %c0_61 = arith.constant 0 : index
    %205 = vector.load %arg7[%c0_60, %c0_61] : memref<1x3xf32, #tpu.memory_space<vmem>>, vector<1x3xf32>
    %206 = vector.broadcast %205 : vector<1x3xf32> to vector<8x3xf32>
    %207 = arith.addf %204, %206 : vector<8x3xf32>
    %c0_62 = arith.constant 0 : index
    %c0_63 = arith.constant 0 : index
    %208 = vector.load %arg8[%c0_62, %c0_63] : memref<8x3xf32, #tpu.memory_space<vmem>>, vector<8x3xf32>
    tpu.vector_store %arg8[%c0_62, %c0_63], %207 {strides = array<i32>} : memref<8x3xf32, #tpu.memory_space<vmem>>, vector<8x3xf32>,
    return
  }
  func.func @transform_0(%arg0: i32) -> (i32, i32, i32) {
    %c0_i32 = arith.constant 0 : i32
    %c0_i32_0 = arith.constant 0 : i32
    %c0_i32_1 = arith.constant 0 : i32
    return %arg0, %c0_i32, %c0_i32_0 : i32, i32, i32
  }
  func.func @transform_1(%arg0: i32) -> (i32, i32) {
    %c0_i32 = arith.constant 0 : i32
    %c0_i32_0 = arith.constant 0 : i32
    %c0_i32_1 = arith.constant 0 : i32
    return %c0_i32, %c0_i32_0 : i32, i32
  }
  func.func @transform_2(%arg0: i32) -> (i32, i32) {
    %c0_i32 = arith.constant 0 : i32
    %c0_i32_0 = arith.constant 0 : i32
    %c0_i32_1 = arith.constant 0 : i32
    return %c0_i32, %c0_i32_0 : i32, i32
  }
  func.func @transform_3(%arg0: i32) -> (i32, i32) {
    %c0_i32 = arith.constant 0 : i32
    %c0_i32_0 = arith.constant 0 : i32
    %c0_i32_1 = arith.constant 0 : i32
    return %c0_i32, %c0_i32_0 : i32, i32
  }
  func.func @transform_4(%arg0: i32) -> (i32, i32) {
    %c0_i32 = arith.constant 0 : i32
    %c0_i32_0 = arith.constant 0 : i32
    %c0_i32_1 = arith.constant 0 : i32
    return %c0_i32, %c0_i32_0 : i32, i32
  }
  func.func @transform_5(%arg0: i32) -> (i32, i32) {
    %c0_i32 = arith.constant 0 : i32
    %c0_i32_0 = arith.constant 0 : i32
    %c0_i32_1 = arith.constant 0 : i32
    return %c0_i32, %c0_i32_0 : i32, i32
  }
  func.func @transform_6(%arg0: i32) -> (i32, i32) {
    %c0_i32 = arith.constant 0 : i32
    %c0_i32_0 = arith.constant 0 : i32
    %c0_i32_1 = arith.constant 0 : i32
    return %c0_i32, %c0_i32_0 : i32, i32
  }
  func.func @transform_7(%arg0: i32) -> (i32, i32) {
    %c0_i32 = arith.constant 0 : i32
    %c0_i32_0 = arith.constant 0 : i32
    return %arg0, %c0_i32 : i32, i32
  }
}

</mosaic_0001>

<bundles_post_ra>
// kernel: tpu_custom_call.1
= control target key start
LH: loop header
LB: loop body
LE: loop exit
PB: predicated region body
PF: predicated region fallthrough
CT: control target
= control target key end

     0   :  { %v912_v0 = vmov 0   ;;  %vm108_vm0 = vcmask 1041408   ;;  %v34_v16 = vlaneseq  ;;  %vm83_vm1 = vcmask 408576   ;;  %s915_s22 = smov 64   ;;  %s1169_s0 = inlined_call_operand.vmem [shape: s32[1,64,1], index: 0, kind: input, shape index: {}]   ;;  %s1170_s1 = inlined_call_operand.vmem [shape: f32[50,32], index: 1, kind: input, shape index: {}]   ;;  %s1171_s2 = inlined_call_operand.vmem [shape: f32[32,128], index: 2, kind: input, shape index: {}]   ;;  %s1172_s4 = inlined_call_operand.vmem [shape: f32[1,128], index: 4, kind: input, shape index: {}]   ;;  %s1173_s3 = inlined_call_operand.vmem [shape: f32[32,128], index: 3, kind: input, shape index: {}]   ;;  %s1174_s5 = inlined_call_operand.vmem [shape: f32[32,3], index: 5, kind: input, shape index: {}]   ;;  %s1175_s6 = inlined_call_operand.vmem [shape: f32[1,3], index: 6, kind: input, shape index: {}]   ;;  %s1176_s7 = inlined_call_operand.vmem [shape: f32[8,3], index: 7, kind: output, shape index: {}]  }
   0x1   :  { %844 = vset.pattern.permute.xlu1 %v912_v0  ;;  %843 = vset.pattern.permute.xlu0 %v912_v0  ;;  %v32_v1 = vld [vmem:[%s1169_s0 + $0x30] sm:$0xff]  ;;  %v26_v2 = vld [vmem:[%s1169_s0] sm:$0xff]  ;;  %v81_v5 = vld [vmem:[%s1170_s1 + $0x28] sm:$0xff]  ;;  %v913_v20 = vmov 0.0   ;;  %vm161_vm10 = vcmask 261120  }
   0x2   :  { %55 = vperm.xlu0 %843, %v32_v1   ;;  %37 = vperm.xlu1 %844, %v26_v2   ;;  %v28_v3 = vld [vmem:[%s1169_s0 + $0x10] sm:$0xff]  ;;  %v80_v6 = vld [vmem:[%s1170_s1 + $0x20] sm:$0xff]  ;;  %v33_v7 = vld [vmem:[%s1169_s0 + $0x38] sm:$0xff]  ;;  %v35_v17 = vand.u32 127, %v34_v16 }
   0x3   :  { %845 = vset.pattern.permute.xlu2 %v912_v0  ;;  %v82_v4 = vld [vmem:[%s1170_s1 + $0x30] sm:$0x3]  ;;  %v27_v8 = vld [vmem:[%s1169_s0 + $0x8] sm:$0xff]  ;;  %v79_v9 = vld [vmem:[%s1170_s1 + $0x18] sm:$0xff] }
   0x4   :  { %43 = vperm.xlu2 %845, %v28_v3   ;;  %795 = vmatpush.msk.msra.mxu0 %vm108_vm0, %v82_v4  ;;  %v29_v10 = vld [vmem:[%s1169_s0 + $0x18] sm:$0xff]  ;;  %v78_v11 = vld [vmem:[%s1170_s1 + $0x10] sm:$0xff]  ;;  %v77_v12 = vld [vmem:[%s1170_s1 + $0x8] sm:$0xff] }
   0x5   :  { %828 = vmatpush.msk.msra.mxu3 %vm108_vm0, %v82_v4  ;;  %v30_v13 = vld [vmem:[%s1169_s0 + $0x20] sm:$0xff]  ;;  %v31_v14 = vld [vmem:[%s1169_s0 + $0x28] sm:$0xff]  ;;  %v156_v28 = vld [vmem:[%s1171_s2 + $0x18] sm:$0xff] }
   0x6   :  { %122 = vmatpush.msra.mxu0 %v81_v5  ;;  %v76_v15 = vld [vmem:[%s1170_s1] sm:$0xff]  ;;  %v155_v29 = vld [vmem:[%s1171_s2 + $0x10] sm:$0xff]  ;;  %198 = vmatpush.msra.mxu1 %v156_v28  ;;  %v154_v30 = vld [vmem:[%s1171_s2 + $0x8] sm:$0xff] }
   0x7   :  { %829 = vmatpush.msra.mxu3 %v81_v5  ;;  %835 = vmatpush.msra.mxu2 %v156_v28  ;;  %v153_v38 = vld [vmem:[%s1171_s2] sm:$0xff]  ;;  %v1032_v39 = vld [vmem:[%s1173_s3 + $0x18] sm:$0xff]  ;;  %v1039_v40 = vld [vmem:[%s1173_s3 + $0x10] sm:$0xff] }
   0x8   :  { %123 = vmatpush.msra.mxu0 %v80_v6  ;;  %199 = vmatpush.msra.mxu1 %v155_v29  ;;  %v1044_v41 = vld [vmem:[%s1173_s3 + $0x8] sm:$0xff]  ;;  %v1051_v42 = vld [vmem:[%s1173_s3] sm:$0xff] }
   0x9   :  { %830 = vmatpush.msra.mxu3 %v80_v6  ;;  %836 = vmatpush.msra.mxu2 %v155_v29  ;;  %v846_v51 = vld [vmem:[%s1172_s4] ss:$0 sm:$0xff]  ;;  %s914_s4 = smov 32  }
   0xa   :  { %58 = vperm.xlu0 %843, %v33_v7   ;;  %40 = vperm.xlu1 %844, %v27_v8  }
   0xb   :  { %124 = vmatpush.msra.mxu0 %v79_v9  ;;  %831 = vmatpush.msra.mxu3 %v79_v9 }
   0xc   :  { %46 = vperm.xlu2 %845, %v29_v10   ;;  %200 = vmatpush.msra.mxu1 %v154_v30 }
   0xd   :  { %125 = vmatpush.msra.mxu0 %v78_v11  ;;  %832 = vmatpush.msra.mxu3 %v78_v11 }
   0xe   :  { %837 = vmatpush.msra.mxu2 %v154_v30  ;;  %201 = vmatpush.msra.mxu1 %v153_v38 }
   0xf   :  { %126 = vmatpush.msra.mxu0 %v77_v12  ;;  %833 = vmatpush.msra.mxu3 %v77_v12 }
  0x10   :  { %838 = vmatpush.msra.mxu2 %v153_v38 }
  0x11   :  { %127 = vmatpush.msra.mxu0 %v76_v15  ;;  %834 = vmatpush.msra.mxu3 %v76_v15 }
  0x12   :  { %49 = vperm.xlu0 %843, %v30_v13   ;;  %52 = vperm.xlu1 %844, %v31_v14  }
  0x13   :  { %256 = vmatpush.msrb.mxu2 %v1032_v39  ;;  %321 = vmatpush.msrb.mxu3 %v1032_v39 }
  0x15   :  { %257 = vmatpush.msrb.mxu2 %v1039_v40  ;;  %322 = vmatpush.msrb.mxu3 %v1039_v40 }
  0x17   :  { %258 = vmatpush.msrb.mxu2 %v1044_v41  ;;  %323 = vmatpush.msrb.mxu3 %v1044_v41 }
  0x19   :  { %259 = vmatpush.msrb.mxu2 %v1051_v42  ;;  %324 = vmatpush.msrb.mxu3 %v1051_v42 }
  0x5e   :  { %v44_v23 = vpop.permute.xlu2 %43 }
  0x5f   :  { %vm62_vm6 = vcmp.eq.s32.totalorder %v35_v17, %v44_v23 }
  0x60   :  { %v70_v31 = vsel %vm62_vm6, 1.0, %v913_v20 }
  0x66   :  { %v47_v32 = vpop.permute.xlu2 %46 }
  0x67   :  { %vm63_vm7 = vcmp.eq.s32.totalorder %v35_v17, %v47_v32 }
  0x68   :  { %v71_v33 = vsel %vm63_vm7, 1.0, %v913_v20 }
  0x74   :  { %v56_v18 = vpop.permute.xlu0 %55  ;;  %v38_v19 = vpop.permute.xlu1 %37 }
  0x75   :  { %vm66_vm2 = vcmp.eq.s32.totalorder %v35_v17, %v56_v18  ;;  %vm60_vm3 = vcmp.eq.s32.totalorder %v35_v17, %v38_v19 }
  0x76   :  { %v74_v21 = vsel %vm66_vm2, 1.0, %v913_v20  ;;  %v68_v22 = vsel %vm60_vm3, 1.0, %v913_v20 }
  0x77   :  { %796 = vmatmul.msk.f32.vlgmr.msra.gmra.mxu0 %vm83_vm1, %v68_v22  ;;  %802 = vmatmul.msk.f32.vlgmr.msra.gmra.mxu3 %vm83_vm1, %v74_v21 }
  0x78   :  { %451 = vmatpush.msra.mxu3 %v1032_v39 }
  0x7a   :  { %452 = vmatpush.msra.mxu3 %v1039_v40 }
  0x7c   :  { %v59_v24 = vpop.permute.xlu0 %58  ;;  %v41_v25 = vpop.permute.xlu1 %40  ;;  %453 = vmatpush.msra.mxu3 %v1044_v41 }
  0x7d   :  { %vm67_vm4 = vcmp.eq.s32.totalorder %v35_v17, %v59_v24  ;;  %vm61_vm5 = vcmp.eq.s32.totalorder %v35_v17, %v41_v25 }
  0x7e   :  { %v75_v26 = vsel %vm67_vm4, 1.0, %v913_v20  ;;  %v69_v27 = vsel %vm61_vm5, 1.0, %v913_v20  ;;  %454 = vmatpush.msra.mxu3 %v1051_v42 }
  0x7f   :  { %797 = vmatmul.msk.f32.gmra.mxu0 %vm83_vm1, %v69_v27  ;;  %803 = vmatmul.msk.f32.gmra.mxu3 %vm83_vm1, %v75_v26 }
  0x84   :  { %v50_v34 = vpop.permute.xlu0 %49  ;;  %v53_v36 = vpop.permute.xlu1 %52 }
  0x85   :  { %vm64_vm8 = vcmp.eq.s32.totalorder %v35_v17, %v50_v34  ;;  %vm65_vm9 = vcmp.eq.s32.totalorder %v35_v17, %v53_v36 }
  0x86   :  { %v72_v35 = vsel %vm64_vm8, 1.0, %v913_v20  ;;  %v73_v37 = vsel %vm65_vm9, 1.0, %v913_v20 }
  0x87   :  { %798 = vmatmul.msk.f32.gmra.mxu0 %vm83_vm1, %v70_v31 }
  0x8f   :  { %799 = vmatmul.msk.f32.gmra.mxu0 %vm83_vm1, %v71_v33 }
  0x97   :  { %800 = vmatmul.msk.f32.gmra.mxu0 %vm83_vm1, %v72_v35 }
  0x9f   :  { %801 = vmatmul.msk.f32.gmra.mxu0 %vm83_vm1, %v73_v37 }
  0xf4   :  { %v129_v43 = vpop.f32.mrf.mxu0 }
  0xf5   :  { %804 = vmatmul.msk.f32.vlgmr.msra.gmra.mxu1 %vm161_vm10, %v129_v43 }
  0xfa   :  { %v147_v44 = vpop.f32.mrf.mxu3 }
  0xfc   :  { %v132_v45 = vpop.f32.mrf.mxu0 }
  0xfd   :  { %805 = vmatmul.msk.f32.gmra.mxu1 %vm161_vm10, %v132_v45 }
 0x102   :  { %v150_v46 = vpop.f32.mrf.mxu3 }
 0x103   :  { %811 = vmatmul.msk.f32.vlgmr.msra.gmra.mxu2 %vm161_vm10, %v150_v46 }
 0x104   :  { %v135_v47 = vpop.f32.mrf.mxu0  ;;  %386 = vmatpush.msra.mxu2 %v1032_v39 }
 0x105   :  { %806 = vmatmul.msk.f32.gmra.mxu1 %vm161_vm10, %v135_v47 }
 0x106   :  { %387 = vmatpush.msra.mxu2 %v1039_v40 }
 0x108   :  { %388 = vmatpush.msra.mxu2 %v1044_v41 }
 0x10a   :  { %389 = vmatpush.msra.mxu2 %v1051_v42 }
 0x10b   :  { %260 = vmatmul.f32.vlgmr.msrb.gmra.mxu2 %v913_v20 }
 0x10c   :  { %v138_v48 = vpop.f32.mrf.mxu0  ;;  %516 = vmatpush.msrb.mxu2 %v1032_v39 }
 0x10d   :  { %807 = vmatmul.msk.f32.gmra.mxu1 %vm161_vm10, %v138_v48 }
 0x10e   :  { %517 = vmatpush.msrb.mxu2 %v1039_v40 }
 0x110   :  { %518 = vmatpush.msrb.mxu2 %v1044_v41 }
 0x112   :  { %519 = vmatpush.msrb.mxu2 %v1051_v42 }
 0x114   :  { %v141_v49 = vpop.f32.mrf.mxu0 }
 0x115   :  { %808 = vmatmul.msk.f32.gmra.mxu1 %vm161_vm10, %v141_v49 }
 0x11c   :  { %v144_v50 = vpop.f32.mrf.mxu0 }
 0x11d   :  { %809 = vmatmul.msk.f32.gmra.mxu1 %vm161_vm10, %v144_v50 }
 0x125   :  { %810 = vmatmul.msk.f32.gmra.mxu1 %vm161_vm10, %v147_v44 }
 0x172   :  { %v203_v52 = vpop.f32.mrf.mxu1 }
 0x173   :  { %v1081_v53 = vadd.f32 %v846_v51, %v203_v52 }
 0x17a   :  { %v206_v54 = vpop.f32.mrf.mxu1 }
 0x17b   :  { %v1083_v55 = vadd.f32 %v846_v51, %v206_v54 }
 0x182   :  { %v209_v56 = vpop.f32.mrf.mxu1 }
 0x183   :  { %v1085_v57 = vadd.f32 %v846_v51, %v209_v56 }
 0x186   :  { %v224_v58 = vpop.f32.mrf.mxu2 }
 0x187   :  { %v225_v61 = vadd.f32 %v846_v51, %v224_v58 }
 0x18a   :  { %v212_v59 = vpop.f32.mrf.mxu1 }
 0x18b   :  { %v1087_v60 = vadd.f32 %v846_v51, %v212_v59 }
 0x18e   :  { %v261_v62 = vpop.f32.mrf.mxu2 }
 0x18f   :  { %v264_v63 = vadd.f32 %v261_v62, %v225_v61 }
 0x191   :  { %848 = vtanh.f32 %v264_v63  ;;  %v812_v5 = vmul.f32 -1.442695, %v264_v63 }
 0x192   :  { %v215_v0 = vpop.f32.mrf.mxu1 }
 0x193   :  { %v1089_v1 = vadd.f32 %v846_v51, %v215_v0  ;;  %850 = vpow2.f32 %v812_v5 }
 0x197   :  { %v849_v2 = vpop.eup %848 }
 0x198   :  { %287 = vrot.lane.b32.xlu2 %v849_v2, %s914_s4 }
 0x199   :  { %v851_v6 = vpop.eup %850 }
 0x19a   :  { %v218_v3 = vpop.f32.mrf.mxu1  ;;  %v268_v7 = vadd.f32 1.0, %v851_v6 }
 0x19b   :  { %v1092_v4 = vadd.f32 %v846_v51, %v218_v3 }
 0x19c   :  { %852 = vrcp.f32 %v268_v7  ;;  %v280_v13 = vand.u32 2147483648, %v268_v7  ;;  %vm274_vm12 = vweird.f32 %v268_v7  ;;  %v278_v14 = vand.u32 2147483647, %v268_v7 }
 0x19e   :  { %v281_v16 = vor.u32 1.1754944e-38, %v280_v13  ;;  %vm279_vm14 = vcmp.eq.f32.partialorder %v278_v14, 8.507059e+37 }
 0x1a2   :  { %v853_v8 = vpop.eup %852  ;;  %v221_v27 = vpop.f32.mrf.mxu1 }
 0x1a3   :  { %v270_v9 = vmul.f32 %v853_v8, %v268_v7  ;;  %vm275_vm11 = vweird.f32 %v853_v8  ;;  %v222_v28 = vadd.f32 %v846_v51, %v221_v27 }
 0x1a4   :  { %vm276_vm13 = vmor %vm274_vm12, %vm275_vm11 }
 0x1a5   :  { %v271_v10 = vsub.f32 1.0, %v270_v9 }
 0x1a7   :  { %v272_v11 = vmul.f32 %v853_v8, %v271_v10 }
 0x1a9   :  { %v273_v12 = vadd.f32 %v853_v8, %v272_v11 }
 0x1ab   :  { %v277_v15 = vsel %vm276_vm13, %v853_v8, %v273_v12 }
 0x1ac   :  { %v282_v17 = vsel %vm279_vm14, %v281_v16, %v277_v15 }
 0x1ad   :  { %v285_v20 = vmul.f32 0.0, %v282_v17 }
 0x1f2   :  { %v288_v18 = vpop.permute.xlu2 %287 }
 0x1f3   :  { %v290_v19 = vmul.f32 %v288_v18, %v282_v17 }
 0x1f5   :  { %292 = vrot.lane.b32.xlu0 %v290_v19, %s914_s4 }
 0x267   :  { %v293_v21 = vpop.permute.xlu0 %292 }
 0x268   :  { %v295_v22 = vadd.f32 %v293_v21, %v285_v20 }
 0x26a   :  { %854 = vtanh.f32 %v295_v22 }
 0x270   :  { %v855_v23 = vpop.eup %854 }
 0x271   :  { %298 = vrot.lane.b32.xlu1 %v855_v23, %s914_s4 }
 0x2e3   :  { %v299_v24 = vpop.permute.xlu1 %298 }
 0x2e4   :  { %v301_v25 = vmul.f32 %v299_v24, %v282_v17 }
 0x2e6   :  { %305 = vrot.lane.b32.xlu2 %v301_v25, %s915_s22 }
 0x340   :  { %v306_v26 = vpop.permute.xlu2 %305 }
 0x341   :  { %813 = vmatmul.msk.f32.vlgmr.msrb.gmra.mxu3 %vm161_vm10, %v306_v26 }
 0x342   :  { %581 = vmatpush.msrb.mxu3 %v1032_v39 }
 0x344   :  { %582 = vmatpush.msrb.mxu3 %v1039_v40 }
 0x346   :  { %583 = vmatpush.msrb.mxu3 %v1044_v41 }
 0x348   :  { %584 = vmatpush.msrb.mxu3 %v1051_v42 }
 0x3c4   :  { %v326_v29 = vpop.f32.mrf.mxu3 }
 0x3c5   :  { %v329_v30 = vadd.f32 %v326_v29, %v222_v28 }
 0x3c7   :  { %856 = vtanh.f32 %v329_v30  ;;  %v814_v32 = vmul.f32 -1.442695, %v329_v30 }
 0x3c9   :  { %858 = vpow2.f32 %v814_v32 }
 0x3cd   :  { %v857_v31 = vpop.eup %856 }
 0x3ce   :  { %352 = vrot.lane.b32.xlu0 %v857_v31, %s914_s4 }
 0x3cf   :  { %v859_v33 = vpop.eup %858 }
 0x3d0   :  { %v333_v34 = vadd.f32 1.0, %v859_v33 }
 0x3d2   :  { %860 = vrcp.f32 %v333_v34  ;;  %v345_v44 = vand.u32 2147483648, %v333_v34  ;;  %vm339_vm0 = vweird.f32 %v333_v34  ;;  %v343_v45 = vand.u32 2147483647, %v333_v34 }
 0x3d4   :  { %v346_v47 = vor.u32 1.1754944e-38, %v345_v44  ;;  %vm344_vm2 = vcmp.eq.f32.partialorder %v343_v45, 8.507059e+37 }
 0x3d8   :  { %v861_v35 = vpop.eup %860 }
 0x3d9   :  { %v335_v36 = vmul.f32 %v861_v35, %v333_v34  ;;  %vm340_vm15 = vweird.f32 %v861_v35 }
 0x3da   :  { %vm341_vm1 = vmor %vm339_vm0, %vm340_vm15 }
 0x3db   :  { %v336_v37 = vsub.f32 1.0, %v335_v36 }
 0x3dd   :  { %v337_v38 = vmul.f32 %v861_v35, %v336_v37 }
 0x3df   :  { %v338_v43 = vadd.f32 %v861_v35, %v337_v38 }
 0x3e1   :  { %v342_v46 = vsel %vm341_vm1, %v861_v35, %v338_v43 }
 0x3e2   :  { %v347_v49 = vsel %vm344_vm2, %v346_v47, %v342_v46 }
 0x3e3   :  { %v350_v51 = vmul.f32 %v347_v49, %v295_v22 }
 0x440   :  { %v353_v48 = vpop.permute.xlu0 %352 }
 0x441   :  { %v355_v50 = vmul.f32 %v353_v48, %v347_v49 }
 0x443   :  { %357 = vrot.lane.b32.xlu1 %v355_v50, %s914_s4 }
 0x4b5   :  { %v358_v52 = vpop.permute.xlu1 %357 }
 0x4b6   :  { %v360_v54 = vadd.f32 %v358_v52, %v350_v51 }
 0x4b8   :  { %862 = vtanh.f32 %v360_v54 }
 0x4be   :  { %v863_v56 = vpop.eup %862 }
 0x4bf   :  { %363 = vrot.lane.b32.xlu2 %v863_v56, %s914_s4 }
 0x519   :  { %v364_v58 = vpop.permute.xlu2 %363 }
 0x51a   :  { %v366_v59 = vmul.f32 %v364_v58, %v347_v49 }
 0x51c   :  { %370 = vrot.lane.b32.xlu0 %v366_v59, %s915_s22 }
 0x58e   :  { %v371_v61 = vpop.permute.xlu0 %370 }
 0x58f   :  { %815 = vmatmul.msk.f32.vlgmr.msra.gmra.mxu2 %vm161_vm10, %v371_v61 }
 0x590   :  { %646 = vmatpush.msra.mxu2 %v1032_v39 }
 0x592   :  { %647 = vmatpush.msra.mxu2 %v1039_v40 }
 0x594   :  { %648 = vmatpush.msra.mxu2 %v1044_v41 }
 0x596   :  { %649 = vmatpush.msra.mxu2 %v1051_v42 }
 0x612   :  { %v391_v62 = vpop.f32.mrf.mxu2 }
 0x613   :  { %v394_v63 = vadd.f32 %v391_v62, %v1092_v4 }
 0x615   :  { %864 = vtanh.f32 %v394_v63  ;;  %v816_v2 = vmul.f32 -1.442695, %v394_v63 }
 0x617   :  { %866 = vpow2.f32 %v816_v2 }
 0x61b   :  { %v865_v0 = vpop.eup %864 }
 0x61c   :  { %417 = vrot.lane.b32.xlu1 %v865_v0, %s914_s4 }
 0x61d   :  { %v867_v3 = vpop.eup %866 }
 0x61e   :  { %v398_v5 = vadd.f32 1.0, %v867_v3 }
 0x620   :  { %868 = vrcp.f32 %v398_v5  ;;  %v410_v11 = vand.u32 2147483648, %v398_v5  ;;  %vm404_vm4 = vweird.f32 %v398_v5  ;;  %v408_v12 = vand.u32 2147483647, %v398_v5 }
 0x622   :  { %v411_v13 = vor.u32 1.1754944e-38, %v410_v11  ;;  %vm409_vm6 = vcmp.eq.f32.partialorder %v408_v12, 8.507059e+37 }
 0x626   :  { %v869_v6 = vpop.eup %868 }
 0x627   :  { %v400_v7 = vmul.f32 %v869_v6, %v398_v5  ;;  %vm405_vm3 = vweird.f32 %v869_v6 }
 0x628   :  { %vm406_vm5 = vmor %vm404_vm4, %vm405_vm3 }
 0x629   :  { %v401_v8 = vsub.f32 1.0, %v400_v7 }
 0x62b   :  { %v402_v9 = vmul.f32 %v869_v6, %v401_v8 }
 0x62d   :  { %v403_v10 = vadd.f32 %v869_v6, %v402_v9 }
 0x62f   :  { %v407_v4 = vsel %vm406_vm5, %v869_v6, %v403_v10 }
 0x630   :  { %v412_v15 = vsel %vm409_vm6, %v411_v13, %v407_v4 }
 0x631   :  { %v415_v17 = vmul.f32 %v412_v15, %v360_v54 }
 0x68e   :  { %v418_v14 = vpop.permute.xlu1 %417 }
 0x68f   :  { %v420_v16 = vmul.f32 %v418_v14, %v412_v15 }
 0x691   :  { %422 = vrot.lane.b32.xlu2 %v420_v16, %s914_s4 }
 0x6eb   :  { %v423_v18 = vpop.permute.xlu2 %422 }
 0x6ec   :  { %v425_v19 = vadd.f32 %v423_v18, %v415_v17 }
 0x6ee   :  { %870 = vtanh.f32 %v425_v19 }
 0x6f4   :  { %v871_v20 = vpop.eup %870 }
 0x6f5   :  { %428 = vrot.lane.b32.xlu0 %v871_v20, %s914_s4 }
 0x767   :  { %v429_v21 = vpop.permute.xlu0 %428 }
 0x768   :  { %v431_v22 = vmul.f32 %v429_v21, %v412_v15 }
 0x76a   :  { %435 = vrot.lane.b32.xlu1 %v431_v22, %s915_s22 }
 0x7dc   :  { %v436_v23 = vpop.permute.xlu1 %435 }
 0x7dd   :  { %817 = vmatmul.msk.f32.vlgmr.msra.gmra.mxu3 %vm161_vm10, %v436_v23 }
 0x7de   :  { %710 = vmatpush.msra.mxu3 %v1032_v39 }
 0x7e0   :  { %711 = vmatpush.msra.mxu3 %v1039_v40 }
 0x7e2   :  { %712 = vmatpush.msra.mxu3 %v1044_v41 }
 0x7e4   :  { %713 = vmatpush.msra.mxu3 %v1051_v42 }
 0x860   :  { %v456_v24 = vpop.f32.mrf.mxu3 }
 0x861   :  { %v459_v25 = vadd.f32 %v456_v24, %v1089_v1 }
 0x863   :  { %872 = vtanh.f32 %v459_v25  ;;  %v818_v27 = vmul.f32 -1.442695, %v459_v25 }
 0x865   :  { %874 = vpow2.f32 %v818_v27 }
 0x869   :  { %v873_v26 = vpop.eup %872 }
 0x86a   :  { %482 = vrot.lane.b32.xlu2 %v873_v26, %s914_s4 }
 0x86b   :  { %v875_v28 = vpop.eup %874 }
 0x86c   :  { %v463_v29 = vadd.f32 1.0, %v875_v28 }
 0x86e   :  { %876 = vrcp.f32 %v463_v29  ;;  %v475_v41 = vand.u32 2147483648, %v463_v29  ;;  %vm469_vm8 = vweird.f32 %v463_v29  ;;  %v473_v42 = vand.u32 2147483647, %v463_v29 }
 0x870   :  { %v476_v33 = vor.u32 1.1754944e-38, %v475_v41  ;;  %vm474_vm11 = vcmp.eq.f32.partialorder %v473_v42, 8.507059e+37 }
 0x874   :  { %v877_v30 = vpop.eup %876 }
 0x875   :  { %v465_v39 = vmul.f32 %v877_v30, %v463_v29  ;;  %vm470_vm7 = vweird.f32 %v877_v30 }
 0x876   :  { %vm471_vm9 = vmor %vm469_vm8, %vm470_vm7 }
 0x877   :  { %v466_v31 = vsub.f32 1.0, %v465_v39 }
 0x879   :  { %v467_v40 = vmul.f32 %v877_v30, %v466_v31 }
 0x87b   :  { %v468_v32 = vadd.f32 %v877_v30, %v467_v40 }
 0x87d   :  { %v472_v1 = vsel %vm471_vm9, %v877_v30, %v468_v32 }
 0x87e   :  { %v477_v35 = vsel %vm474_vm11, %v476_v33, %v472_v1 }
 0x87f   :  { %v480_v37 = vmul.f32 %v477_v35, %v425_v19 }
 0x8c4   :  { %v483_v34 = vpop.permute.xlu2 %482 }
 0x8c5   :  { %v485_v36 = vmul.f32 %v483_v34, %v477_v35 }
 0x8c7   :  { %487 = vrot.lane.b32.xlu0 %v485_v36, %s914_s4 }
 0x939   :  { %v488_v38 = vpop.permute.xlu0 %487 }
 0x93a   :  { %v490_v43 = vadd.f32 %v488_v38, %v480_v37 }
 0x93c   :  { %878 = vtanh.f32 %v490_v43 }
 0x942   :  { %v879_v44 = vpop.eup %878 }
 0x943   :  { %493 = vrot.lane.b32.xlu1 %v879_v44, %s914_s4 }
 0x9b5   :  { %v494_v45 = vpop.permute.xlu1 %493 }
 0x9b6   :  { %v496_v46 = vmul.f32 %v494_v45, %v477_v35 }
 0x9b8   :  { %500 = vrot.lane.b32.xlu2 %v496_v46, %s915_s22 }
 0xa12   :  { %v501_v47 = vpop.permute.xlu2 %500 }
 0xa13   :  { %819 = vmatmul.msk.f32.vlgmr.msrb.gmra.mxu2 %vm161_vm10, %v501_v47 }
 0xa96   :  { %v521_v48 = vpop.f32.mrf.mxu2 }
 0xa97   :  { %v524_v49 = vadd.f32 %v521_v48, %v1087_v60 }
 0xa99   :  { %880 = vtanh.f32 %v524_v49  ;;  %v820_v51 = vmul.f32 -1.442695, %v524_v49 }
 0xa9b   :  { %882 = vpow2.f32 %v820_v51 }
 0xa9f   :  { %v881_v50 = vpop.eup %880 }
 0xaa0   :  { %547 = vrot.lane.b32.xlu0 %v881_v50, %s914_s4 }
 0xaa1   :  { %v883_v52 = vpop.eup %882 }
 0xaa2   :  { %v528_v54 = vadd.f32 1.0, %v883_v52 }
 0xaa4   :  { %884 = vrcp.f32 %v528_v54  ;;  %v540_v63 = vand.u32 2147483648, %v528_v54  ;;  %vm534_vm13 = vweird.f32 %v528_v54  ;;  %v538_v0 = vand.u32 2147483647, %v528_v54 }
 0xaa6   :  { %v541_v2 = vor.u32 1.1754944e-38, %v540_v63  ;;  %vm539_vm15 = vcmp.eq.f32.partialorder %v538_v0, 8.507059e+37 }
 0xaaa   :  { %v885_v56 = vpop.eup %884 }
 0xaab   :  { %v530_v58 = vmul.f32 %v885_v56, %v528_v54  ;;  %vm535_vm12 = vweird.f32 %v885_v56 }
 0xaac   :  { %vm536_vm14 = vmor %vm534_vm13, %vm535_vm12  ;;  %vm789_vm13 = vcmask 23552  }
 0xaad   :  { %v531_v59 = vsub.f32 1.0, %v530_v58 }
 0xaaf   :  { %v532_v61 = vmul.f32 %v885_v56, %v531_v59 }
 0xab1   :  { %v533_v62 = vadd.f32 %v885_v56, %v532_v61 }
 0xab3   :  { %v537_v60 = vsel %vm536_vm14, %v885_v56, %v533_v62 }
 0xab4   :  { %v542_v5 = vsel %vm539_vm15, %v541_v2, %v537_v60 }
 0xab5   :  { %v545_v7 = vmul.f32 %v542_v5, %v490_v43 }
 0xb12   :  { %v548_v3 = vpop.permute.xlu0 %547 }
 0xb13   :  { %v550_v6 = vmul.f32 %v548_v3, %v542_v5 }
 0xb15   :  { %552 = vrot.lane.b32.xlu1 %v550_v6, %s914_s4 }
 0xb87   :  { %v553_v8 = vpop.permute.xlu1 %552 }
 0xb88   :  { %v555_v9 = vadd.f32 %v553_v8, %v545_v7 }
 0xb8a   :  { %886 = vtanh.f32 %v555_v9 }
 0xb90   :  { %v887_v10 = vpop.eup %886 }
 0xb91   :  { %558 = vrot.lane.b32.xlu2 %v887_v10, %s914_s4 }
 0xbeb   :  { %v559_v11 = vpop.permute.xlu2 %558 }
 0xbec   :  { %v561_v12 = vmul.f32 %v559_v11, %v542_v5 }
 0xbee   :  { %565 = vrot.lane.b32.xlu0 %v561_v12, %s915_s22 }
 0xc60   :  { %v566_v4 = vpop.permute.xlu0 %565 }
 0xc61   :  { %821 = vmatmul.msk.f32.vlgmr.msrb.gmra.mxu3 %vm161_vm10, %v566_v4 }
 0xce4   :  { %v586_v13 = vpop.f32.mrf.mxu3 }
 0xce5   :  { %v589_v14 = vadd.f32 %v586_v13, %v1085_v57 }
 0xce7   :  { %888 = vtanh.f32 %v589_v14  ;;  %v822_v16 = vmul.f32 -1.442695, %v589_v14 }
 0xce9   :  { %890 = vpow2.f32 %v822_v16 }
 0xced   :  { %v889_v15 = vpop.eup %888 }
 0xcee   :  { %612 = vrot.lane.b32.xlu1 %v889_v15, %s914_s4 }
 0xcef   :  { %v891_v17 = vpop.eup %890 }
 0xcf0   :  { %v593_v18 = vadd.f32 1.0, %v891_v17 }
 0xcf2   :  { %892 = vrcp.f32 %v593_v18  ;;  %v605_v24 = vand.u32 2147483648, %v593_v18  ;;  %vm599_vm1 = vweird.f32 %v593_v18  ;;  %v603_v25 = vand.u32 2147483647, %v593_v18 }
 0xcf4   :  { %v606_v26 = vor.u32 1.1754944e-38, %v605_v24  ;;  %vm604_vm3 = vcmp.eq.f32.partialorder %v603_v25, 8.507059e+37  ;;  %v756_v24 = vld [vmem:[%s1174_s5] sm:$0xff] }
 0xcf8   :  { %v893_v19 = vpop.eup %892 }
 0xcf9   :  { %v595_v20 = vmul.f32 %v893_v19, %v593_v18  ;;  %vm600_vm0 = vweird.f32 %v893_v19 }
 0xcfa   :  { %vm601_vm2 = vmor %vm599_vm1, %vm600_vm0 }
 0xcfb   :  { %v596_v21 = vsub.f32 1.0, %v595_v20 }
 0xcfd   :  { %v597_v22 = vmul.f32 %v893_v19, %v596_v21  ;;  %v759_v21 = vld [vmem:[%s1174_s5 + $0x18] sm:$0xff] }
 0xcfe   :  { %781 = vmatpush.msrb.mxu2 %v759_v21 }
 0xcff   :  { %v598_v23 = vadd.f32 %v893_v19, %v597_v22  ;;  %v758_v22 = vld [vmem:[%s1174_s5 + $0x10] sm:$0xff] }
 0xd00   :  { %782 = vmatpush.msrb.mxu2 %v758_v22 }
 0xd01   :  { %v602_v57 = vsel %vm601_vm2, %v893_v19, %v598_v23  ;;  %v757_v23 = vld [vmem:[%s1174_s5 + $0x8] sm:$0xff] }
 0xd02   :  { %v607_v28 = vsel %vm604_vm3, %v606_v26, %v602_v57  ;;  %783 = vmatpush.msrb.mxu2 %v757_v23 }
 0xd03   :  { %v610_v30 = vmul.f32 %v607_v28, %v555_v9 }
 0xd04   :  { %784 = vmatpush.msrb.mxu2 %v756_v24 }
 0xd60   :  { %v613_v27 = vpop.permute.xlu1 %612 }
 0xd61   :  { %v615_v29 = vmul.f32 %v613_v27, %v607_v28  ;;  %v847_v27 = vld [vmem:[%s1175_s6] ss:$0 sm:$0xff] }
 0xd63   :  { %617 = vrot.lane.b32.xlu2 %v615_v29, %s914_s4 }
 0xdbd   :  { %v618_v39 = vpop.permute.xlu2 %617 }
 0xdbe   :  { %v620_v31 = vadd.f32 %v618_v39, %v610_v30 }
 0xdc0   :  { %894 = vtanh.f32 %v620_v31 }
 0xdc6   :  { %v895_v40 = vpop.eup %894 }
 0xdc7   :  { %623 = vrot.lane.b32.xlu0 %v895_v40, %s914_s4 }
 0xe39   :  { %v624_v32 = vpop.permute.xlu0 %623 }
 0xe3a   :  { %v626_v41 = vmul.f32 %v624_v32, %v607_v28 }
 0xe3c   :  { %630 = vrot.lane.b32.xlu1 %v626_v41, %s915_s22 }
 0xeae   :  { %v631_v42 = vpop.permute.xlu1 %630 }
 0xeaf   :  { %823 = vmatmul.msk.f32.vlgmr.msra.gmra.mxu2 %vm161_vm10, %v631_v42 }
 0xf32   :  { %v651_v1 = vpop.f32.mrf.mxu2 }
 0xf33   :  { %v654_v33 = vadd.f32 %v651_v1, %v1083_v55 }
 0xf35   :  { %896 = vtanh.f32 %v654_v33  ;;  %v824_v35 = vmul.f32 -1.442695, %v654_v33 }
 0xf37   :  { %898 = vpow2.f32 %v824_v35 }
 0xf3b   :  { %v897_v34 = vpop.eup %896 }
 0xf3c   :  { %677 = vrot.lane.b32.xlu2 %v897_v34, %s914_s4 }
 0xf3d   :  { %v899_v36 = vpop.eup %898 }
 0xf3e   :  { %v658_v37 = vadd.f32 1.0, %v899_v36 }
 0xf40   :  { %900 = vrcp.f32 %v658_v37  ;;  %v670_v47 = vand.u32 2147483648, %v658_v37  ;;  %vm664_vm5 = vweird.f32 %v658_v37  ;;  %v668_v48 = vand.u32 2147483647, %v658_v37 }
 0xf42   :  { %v671_v49 = vor.u32 1.1754944e-38, %v670_v47  ;;  %vm669_vm7 = vcmp.eq.f32.partialorder %v668_v48, 8.507059e+37 }
 0xf46   :  { %v901_v38 = vpop.eup %900 }
 0xf47   :  { %v660_v43 = vmul.f32 %v901_v38, %v658_v37  ;;  %vm665_vm4 = vweird.f32 %v901_v38 }
 0xf48   :  { %vm666_vm6 = vmor %vm664_vm5, %vm665_vm4 }
 0xf49   :  { %v661_v44 = vsub.f32 1.0, %v660_v43 }
 0xf4b   :  { %v662_v45 = vmul.f32 %v901_v38, %v661_v44 }
 0xf4d   :  { %v663_v46 = vadd.f32 %v901_v38, %v662_v45 }
 0xf4f   :  { %v667_v55 = vsel %vm666_vm6, %v901_v38, %v663_v46 }
 0xf50   :  { %v672_v51 = vsel %vm669_vm7, %v671_v49, %v667_v55 }
 0xf51   :  { %v675_v54 = vmul.f32 %v672_v51, %v620_v31 }
 0xf96   :  { %v678_v50 = vpop.permute.xlu2 %677 }
 0xf97   :  { %v680_v52 = vmul.f32 %v678_v50, %v672_v51 }
 0xf99   :  { %682 = vrot.lane.b32.xlu0 %v680_v52, %s914_s4 }
0x100b   :  { %v683_v56 = vpop.permute.xlu0 %682 }
0x100c   :  { %v685_v58 = vadd.f32 %v683_v56, %v675_v54 }
0x100e   :  { %902 = vtanh.f32 %v685_v58 }
0x1014   :  { %v903_v59 = vpop.eup %902 }
0x1015   :  { %688 = vrot.lane.b32.xlu1 %v903_v59, %s914_s4 }
0x1087   :  { %v689_v61 = vpop.permute.xlu1 %688 }
0x1088   :  { %v691_v62 = vmul.f32 %v689_v61, %v672_v51 }
0x108a   :  { %694 = vrot.lane.b32.xlu2 %v691_v62, %s915_s22 }
0x10e4   :  { %v695_v63 = vpop.permute.xlu2 %694 }
0x10e5   :  { %825 = vmatmul.msk.f32.vlgmr.msra.gmra.mxu3 %vm161_vm10, %v695_v63 }
0x1168   :  { %v715_v0 = vpop.f32.mrf.mxu3 }
0x1169   :  { %v718_v60 = vadd.f32 %v715_v0, %v1081_v53 }
0x116b   :  { %904 = vtanh.f32 %v718_v60  ;;  %v826_v3 = vmul.f32 -1.442695, %v718_v60 }
0x116d   :  { %906 = vpow2.f32 %v826_v3 }
0x1171   :  { %v905_v2 = vpop.eup %904 }
0x1172   :  { %741 = vrot.lane.b32.xlu0 %v905_v2, %s914_s4 }
0x1173   :  { %v907_v5 = vpop.eup %906 }
0x1174   :  { %v722_v6 = vadd.f32 1.0, %v907_v5 }
0x1176   :  { %908 = vrcp.f32 %v722_v6  ;;  %v734_v12 = vand.u32 2147483648, %v722_v6  ;;  %vm728_vm9 = vweird.f32 %v722_v6  ;;  %v732_v4 = vand.u32 2147483647, %v722_v6 }
0x1178   :  { %v735_v13 = vor.u32 1.1754944e-38, %v734_v12  ;;  %vm733_vm12 = vcmp.eq.f32.partialorder %v732_v4, 8.507059e+37 }
0x117c   :  { %v909_v7 = vpop.eup %908 }
0x117d   :  { %v724_v8 = vmul.f32 %v909_v7, %v722_v6  ;;  %vm729_vm8 = vweird.f32 %v909_v7 }
0x117e   :  { %vm730_vm11 = vmor %vm728_vm9, %vm729_vm8 }
0x117f   :  { %v725_v9 = vsub.f32 1.0, %v724_v8 }
0x1181   :  { %v726_v10 = vmul.f32 %v909_v7, %v725_v9 }
0x1183   :  { %v727_v11 = vadd.f32 %v909_v7, %v726_v10 }
0x1185   :  { %v731_v53 = vsel %vm730_vm11, %v909_v7, %v727_v11 }
0x1186   :  { %v736_v15 = vsel %vm733_vm12, %v735_v13, %v731_v53 }
0x1187   :  { %v739_v17 = vmul.f32 %v736_v15, %v685_v58 }
0x11e4   :  { %v742_v14 = vpop.permute.xlu0 %741 }
0x11e5   :  { %v744_v16 = vmul.f32 %v742_v14, %v736_v15 }
0x11e7   :  { %746 = vrot.lane.b32.xlu1 %v744_v16, %s914_s4 }
0x1259   :  { %v747_v18 = vpop.permute.xlu1 %746 }
0x125a   :  { %v749_v19 = vadd.f32 %v747_v18, %v739_v17 }
0x125c   :  { %910 = vtanh.f32 %v749_v19 }
0x1262   :  { %v911_v20 = vpop.eup %910 }
0x1263   :  { %752 = vrot.lane.b32.xlu2 %v911_v20, %s914_s4 }
0x12bd   :  { %v753_v25 = vpop.permute.xlu2 %752 }
0x12be   :  { %v755_v57 = vmul.f32 %v753_v25, %v736_v15 }
0x12c0   :  { %765 = vrot.lane.b32.xlu0 %v755_v57, %s915_s22 }
0x1332   :  { %v766_v26 = vpop.permute.xlu0 %765 }
0x1333   :  { %827 = vmatmul.msk.f32.vlgmr.msrb.gmra.mxu2 %vm161_vm10, %v766_v26 }
0x13b6   :  { %v786_v28 = vpop.f32.mrf.mxu2 }
0x13b7   :  { %v787_v29 = vadd.f32 %v847_v27, %v786_v28 }
0x13b9   :  { %790 = vst.msk [vmem:[%s1176_s7] sm:$0xff] %vm789_vm13, %v787_v29 }

</bundles_post_ra>
